<compile_context>
chip_gen: v7x
topology: tpu7x:2x2x1
jax: 0.10.0
libtpu: 0.0.40
codegen_flags: <defaults>
</compile_context>

<pallas_src>
import jax
import jax.numpy as jnp
from jax import lax
from jax.experimental import pallas as pl
from jax.experimental.pallas import tpu as pltpu


def _make_fc1_kernel(k_true, tk, n_k, mask_tail):
    """Build the fc1 partial-sum kernel for a fixed tiling.

    Per grid step (s, k):
      x_ref:     (B, tk)    K-chunk of the input (f32, ragged tail masked)
      w1t_ref:   (H, tk)    lane-dense (transposed) K-chunk of W1 (bf16/f32)
      hpart_ref: (1, B, H)  per-split partial pre-activation (output block)
      acc_ref:   (B, H) f32 VMEM accumulator (per-core)
    """

    def kernel(x_ref, w1t_ref, hpart_ref, acc_ref):
        s = pl.program_id(0)
        k = pl.program_id(1)

        @pl.when(k == 0)
        def _():
            acc_ref[...] = jnp.zeros_like(acc_ref)

        x_blk = x_ref[...]
        if mask_tail:
            # Global column index of each element of this block; zero the
            # out-of-range tail explicitly (do NOT rely on garbage * 0).
            col0 = (s * n_k + k) * tk
            col = col0 + lax.broadcasted_iota(jnp.int32, x_blk.shape, 1)
            x_blk = jnp.where(col < k_true, x_blk, 0.0)

        # Match the streamed-weight dtype so the MXU runs at the narrow rate
        # on the bf16 path (no-op for f32 weights).
        x_blk = x_blk.astype(w1t_ref.dtype)

        # Contract the lane axis of both operands: (B, tk) x (H, tk) -> (B, H)
        # -- same transposed-RHS pattern as flash attention's q.k^T; no
        # in-kernel transpose of the big (H, tk) tile.
        acc_ref[...] += lax.dot_general(
            x_blk, w1t_ref[...],
            dimension_numbers=(((1,), (1,)), ((), ())),
            preferred_element_type=jnp.float32,
        )

        @pl.when(k == n_k - 1)
        def _():
            hpart_ref[0] = acc_ref[...].astype(hpart_ref.dtype)

    return kernel


def make_dqn_forward(w1, b1, w2, b2, *, tk=131072, n_splits=1,
                     weight_dtype=jnp.bfloat16,
                     vmem_limit_bytes=48 * 1024 * 1024):
    """One-time init: prepare W1 for streaming and return a jitted forward.

    In production the fc1 weight should simply be *stored* in this prepared
    (H, K_padded) layout/dtype; the transpose/pad/cast here runs once, not
    per call.
    """
    K, H = w1.shape
    O = w2.shape[1]

    # Clamp tk for small problems; keep it 128-aligned (lane constraint).
    per_split = pl.cdiv(K, n_splits)
    tk = max(128, min(tk, pl.cdiv(per_split, 128) * 128))
    n_k = pl.cdiv(K, n_splits * tk)          # K-steps per split
    k_pad = n_splits * n_k * tk              # padded K (tile multiple)
    mask_tail = (k_pad != K)

    # ---- one-time weight prep (NOT in the per-call hot path) ----
    w1t = jnp.asarray(w1, jnp.float32).T     # lane-dense (H, K)
    if mask_tail:
        # Explicit zero columns: contribute nothing to the reduction.
        w1t = jnp.pad(w1t, ((0, 0), (0, k_pad - K)))
    w1t = w1t.astype(weight_dtype)
    b1 = jnp.asarray(b1, jnp.float32)
    w2 = jnp.asarray(w2, jnp.float32)
    b2 = jnp.asarray(b2, jnp.float32)

    kernel = _make_fc1_kernel(K, tk, n_k, mask_tail)

    def forward(x, w1t, b1, w2, b2):
        B = x.shape[0]
        hpart = pl.pallas_call(
            kernel,
            out_shape=jax.ShapeDtypeStruct((n_splits, B, H), jnp.float32),
            grid_spec=pltpu.PrefetchScalarGridSpec(
                num_scalar_prefetch=0,
                grid=(n_splits, n_k),
                in_specs=[
                    # x: (B, tk) K-chunk; ragged tail handled in-kernel.
                    pl.BlockSpec((B, tk), lambda s, k: (0, s * n_k + k)),
                    # W1^T: lane-dense (H, tk) tile over padded K.
                    pl.BlockSpec((H, tk), lambda s, k: (0, s * n_k + k)),
                ],
                # Each split writes its own partial block -> megacore safe.
                out_specs=pl.BlockSpec((1, B, H), lambda s, k: (s, 0, 0)),
                scratch_shapes=[pltpu.VMEM((B, H), jnp.float32)],
            ),
            compiler_params=pltpu.CompilerParams(
                # split axis parallel (2-TC sharding on v7x); K is a reduction.
                dimension_semantics=("parallel", "arbitrary"),
                vmem_limit_bytes=vmem_limit_bytes,
            ),
        )(x, w1t)

        # Tiny (B, 30) epilogue in plain XLA: combine partials, bias+ReLU, fc2.
        h = jnp.maximum(hpart.sum(axis=0) + b1[None, :], 0.0)
        return h @ w2 + b2[None, :]

    fwd = jax.jit(forward)
    return lambda x: fwd(x, w1t, b1, w2, b2)


def dqn_reference(x, w1, b1, w2, b2):
    h = jnp.maximum(x @ w1 + b1, 0.0)
    return h @ w2 + b2


def dqn_reference_bf16w(x, w1, b1, w2, b2):
    """Reference with bf16-quantized fc1 operands (f32 accumulation)."""
    h = jnp.dot(x.astype(jnp.bfloat16), w1.astype(jnp.bfloat16),
                preferred_element_type=jnp.float32)
    h = jnp.maximum(h + b1, 0.0)
    return h @ w2 + b2


if __name__ == "__main__":
    # Small shapes consistent with the module (real module: input_size=3e6).
    # 3000 is deliberately NOT 128-aligned to exercise the in-kernel tail
    # masking, mirroring 3_000_000 (which has no 128-aligned divisor).
    batch = 2
    input_size = 3000
    hidden_size = 30
    output_size = 30

    key = jax.random.PRNGKey(0)
    kx, kw1, kb1, kw2, kb2 = jax.random.split(key, 5)

    # PyTorch nn.Linear default init: U(-1/sqrt(fan_in), 1/sqrt(fan_in)).
    bound1 = 1.0 / (input_size ** 0.5)
    bound2 = 1.0 / (hidden_size ** 0.5)
    x = jax.random.normal(kx, (batch, input_size), dtype=jnp.float32)
    w1 = jax.random.uniform(kw1, (input_size, hidden_size),
                            minval=-bound1, maxval=bound1, dtype=jnp.float32)
    b1 = jax.random.uniform(kb1, (hidden_size,),
                            minval=-bound1, maxval=bound1, dtype=jnp.float32)
    w2 = jax.random.uniform(kw2, (hidden_size, output_size),
                            minval=-bound2, maxval=bound2, dtype=jnp.float32)
    b2 = jax.random.uniform(kb2, (output_size,),
                            minval=-bound2, maxval=bound2, dtype=jnp.float32)

    ref_f32 = dqn_reference(x, w1, b1, w2, b2)

    # 1) f32-weight path (exact-dtype check vs the PyTorch-equivalent ref).
    fwd_f32 = make_dqn_forward(w1, b1, w2, b2, weight_dtype=jnp.float32)
    out_f32 = jax.block_until_ready(fwd_f32(x))
    assert out_f32.shape == (batch, output_size)
    assert jnp.allclose(out_f32, ref_f32, atol=1e-3, rtol=1e-3), \
        "f32 kernel mismatch vs reference"

    # 2) Default bf16-weight streaming path (the perf configuration); check
    #    against a reference that uses the same bf16-quantized fc1 operands.
    fwd_bf16 = make_dqn_forward(w1, b1, w2, b2)   # weight_dtype=bf16 default
    out_bf16 = jax.block_until_ready(fwd_bf16(x))
    ref_bf16 = dqn_reference_bf16w(x, w1, b1, w2, b2)
    assert out_bf16.shape == (batch, output_size)
    assert jnp.allclose(out_bf16, ref_bf16, atol=1e-3, rtol=1e-3), \
        "bf16 kernel mismatch vs bf16-quantized reference"

    # 3) Dual-core style split path (n_splits=2, as used on v7x).
    fwd_split = make_dqn_forward(w1, b1, w2, b2, weight_dtype=jnp.float32,
                                 n_splits=2)
    out_split = jax.block_until_ready(fwd_split(x))
    assert jnp.allclose(out_split, ref_f32, atol=1e-3, rtol=1e-3), \
        "split kernel mismatch vs reference"

    print("KERNEL_OK")
</pallas_src>

<mosaic_0001>
module attributes {stable_mosaic.version = 11 : i64} {
  func.func @kernel(%arg0: i32, %arg1: i32, %arg2: memref<2x3072xf32, #tpu.memory_space<vmem>>, %arg3: memref<30x3072xf32, #tpu.memory_space<vmem>>, %arg4: memref<1x2x30xf32, #tpu.memory_space<vmem>>, %arg5: memref<2x30xf32, #tpu.memory_space<vmem>>) attributes {dimension_semantics = [#tpu.dimension_semantics<parallel>, #tpu.dimension_semantics<arbitrary>], iteration_bounds = array<i64: 1, 1>, scalar_prefetch = 0 : i64, scratch_operands = 1 : i64, tpu.core_type = #tpu.core_type<tc>, window_params = [{transform_indices = @transform_0, window_bounds = array<i64: 2, 3072>}, {transform_indices = @transform_1, window_bounds = array<i64: 30, 3072>}, {transform_indices = @transform_2, window_bounds = array<i64: 1, 2, 30>}]} {
    %c0_i32 = arith.constant 0 : i32
    %0 = arith.cmpi eq, %arg1, %c0_i32 : i32
    %1 = arith.extui %0 : i1 to i32
    %c0_i32_0 = arith.constant 0 : i32
    %2 = arith.cmpi ne, %1, %c0_i32_0 : i32
    scf.if %2 {
      %cst_11 = arith.constant 0.000000e+00 : f32
      %22 = vector.broadcast %cst_11 : f32 to vector<2x30xf32>
      %c0_12 = arith.constant 0 : index
      %c0_13 = arith.constant 0 : index
      %23 = vector.load %arg5[%c0_12, %c0_13] : memref<2x30xf32, #tpu.memory_space<vmem>>, vector<2x30xf32>
      tpu.vector_store %arg5[%c0_12, %c0_13], %22 {strides = array<i32>} : memref<2x30xf32, #tpu.memory_space<vmem>>, vector<2x30xf32>,
    } else {
    }
    %c0 = arith.constant 0 : index
    %c0_1 = arith.constant 0 : index
    %3 = vector.load %arg2[%c0, %c0_1] : memref<2x3072xf32, #tpu.memory_space<vmem>>, vector<2x3072xf32>
    %c1_i32 = arith.constant 1 : i32
    %4 = arith.muli %arg0, %c1_i32 : i32
    %5 = arith.addi %4, %arg1 : i32
    %c3072_i32 = arith.constant 3072 : i32
    %6 = arith.muli %5, %c3072_i32 : i32
    %7 = tpu.iota {dimensions = array<i32: 1>} : vector<2x3072xi32>
    %8 = vector.broadcast %6 : i32 to vector<2x3072xi32>
    %9 = arith.addi %8, %7 : vector<2x3072xi32>
    %c3000_i32 = arith.constant 3000 : i32
    %10 = vector.broadcast %c3000_i32 : i32 to vector<2x3072xi32>
    %11 = arith.cmpi slt, %9, %10 : vector<2x3072xi32>
    %cst = arith.constant 0.000000e+00 : f32
    %12 = vector.broadcast %cst : f32 to vector<2x3072xf32>
    %13 = arith.select %11, %3, %12 : vector<2x3072xi1>, vector<2x3072xf32>
    %c0_2 = arith.constant 0 : index
    %c0_3 = arith.constant 0 : index
    %14 = vector.load %arg5[%c0_2, %c0_3] : memref<2x30xf32, #tpu.memory_space<vmem>>, vector<2x30xf32>
    %c0_4 = arith.constant 0 : index
    %c0_5 = arith.constant 0 : index
    %15 = vector.load %arg3[%c0_4, %c0_5] : memref<30x3072xf32, #tpu.memory_space<vmem>>, vector<30x3072xf32>
    %cst_6 = arith.constant dense<0.000000e+00> : vector<2x30xf32>
    %16 = tpu.matmul %13, %15, %cst_6 {dimension_numbers = #tpu.dot_dimension_numbers<[1], [1], [0], [0], [0, 0, 1, 0], [], []>} : vector<2x3072xf32>, vector<30x3072xf32>, vector<2x30xf32> -> vector<2x30xf32>
    %17 = arith.addf %14, %16 : vector<2x30xf32>
    %c0_7 = arith.constant 0 : index
    %c0_8 = arith.constant 0 : index
    %18 = vector.load %arg5[%c0_7, %c0_8] : memref<2x30xf32, #tpu.memory_space<vmem>>, vector<2x30xf32>
    tpu.vector_store %arg5[%c0_7, %c0_8], %17 {strides = array<i32>} : memref<2x30xf32, #tpu.memory_space<vmem>>, vector<2x30xf32>,
    %c0_i32_9 = arith.constant 0 : i32
    %19 = arith.cmpi eq, %arg1, %c0_i32_9 : i32
    %20 = arith.extui %19 : i1 to i32
    %c0_i32_10 = arith.constant 0 : i32
    %21 = arith.cmpi ne, %20, %c0_i32_10 : i32
    scf.if %21 {
      %c0_11 = arith.constant 0 : index
      %c0_12 = arith.constant 0 : index
      %22 = vector.load %arg5[%c0_11, %c0_12] : memref<2x30xf32, #tpu.memory_space<vmem>>, vector<2x30xf32>
      %c0_13 = arith.constant 0 : index
      %c0_14 = arith.constant 0 : index
      %c0_15 = arith.constant 0 : index
      %23 = vector.load %arg4[%c0_13, %c0_14, %c0_15] : memref<1x2x30xf32, #tpu.memory_space<vmem>>, vector<1x2x30xf32>
      %24 = vector.shape_cast %23 : vector<1x2x30xf32> to vector<2x30xf32>
      %25 = vector.shape_cast %22 : vector<2x30xf32> to vector<1x2x30xf32>
      tpu.vector_store %arg4[%c0_13, %c0_14, %c0_15], %25 {strides = array<i32>} : memref<1x2x30xf32, #tpu.memory_space<vmem>>, vector<1x2x30xf32>,
    } else {
    }
    return
  }
  func.func @transform_0(%arg0: i32, %arg1: i32) -> (i32, i32) {
    %c1_i32 = arith.constant 1 : i32
    %0 = arith.muli %arg0, %c1_i32 : i32
    %1 = arith.addi %0, %arg1 : i32
    %c0_i32 = arith.constant 0 : i32
    %c0_i32_0 = arith.constant 0 : i32
    return %c0_i32, %1 : i32, i32
  }
  func.func @transform_1(%arg0: i32, %arg1: i32) -> (i32, i32) {
    %c1_i32 = arith.constant 1 : i32
    %0 = arith.muli %arg0, %c1_i32 : i32
    %1 = arith.addi %0, %arg1 : i32
    %c0_i32 = arith.constant 0 : i32
    %c0_i32_0 = arith.constant 0 : i32
    return %c0_i32, %1 : i32, i32
  }
  func.func @transform_2(%arg0: i32, %arg1: i32) -> (i32, i32, i32) {
    %c0_i32 = arith.constant 0 : i32
    %c0_i32_0 = arith.constant 0 : i32
    %c0_i32_1 = arith.constant 0 : i32
    return %arg0, %c0_i32, %c0_i32_0 : i32, i32, i32
  }
}

</mosaic_0001>

<bundles_post_ra>
// kernel: forward.1
= control target key start
LH: loop header
LB: loop body
LE: loop exit
PB: predicated region body
PF: predicated region fallthrough
CT: control target
= control target key end

     0   :  { %7 = vsyncpa [#allocation4], 0  ;;  %s1475_s0 = inlined_call_operand.hbm [shape: f32[2,3000], index: 0, kind: input, shape index: {}]   ;;  %s1476_s1 = inlined_call_operand.hbm [shape: f32[30,3072], index: 1, kind: input, shape index: {}]   ;;  %s1477_s2 = inlined_call_operand.vmem [shape: f32[1,2,30], index: 2, kind: output, shape index: {}]  }
   0x1   :  { %8 = vsyncpa [#allocation6], 0  ;;  %s1401_s9 = smov [#allocation3]   ;;  %s1402_s11 = smov [#allocation5]  }
   0x2   :  { %s19_s10 = sshll.u32 %s1401_s9, 4  ;;  %s32_s12 = sshll.u32 %s1402_s11, 4  ;;  %s20_s10 = int_to_ptr.vmem [resolvable:$true] %s19_s10  ;;  %s1422_s12 = int_to_ptr.vmem [resolvable:$true] %s32_s12 }
   0x3   :  { %s1353_s15 = scalar_lea.hbm %s1475_s0, 768 }
   0x4   :  { %p1354_p0 = scmp.ne.s32.totalorder %s1475_s0, %s1353_s15  ;;  %p1357_p1 = scmp.lt.u32.totalorder %s1353_s15, %s1475_s0 }
   0x6   :  { %p1359_p2 = pnand %p1357_p1, %p1354_p0 }
   0x8   :  { %1362 = shalt.err (!%p1359_p2)
}
   0x9   :  { %s1363_s20 = scalar_lea.vmem %s20_s10, 768  ;;  %p1368_p4 = scmp.lt.s32.totalorder %s20_s10, %s20_s10 }
   0xa   :  { %p1364_p3 = scmp.ne.s32.totalorder %s20_s10, %s1363_s20  ;;  %p1369_p5 = scmp.lt.s32.totalorder %s1363_s20, %s1363_s20 }
   0xc   :  { %p1370_p6 = por %p1369_p5, %p1368_p4 }
   0xe   :  { %p1371_p7 = pnand %p1370_p6, %p1364_p3 }
  0x10   :  { %1374 = shalt.err (!%p1371_p7)
}
  0x11   :  { %22 = dma.hbm_to_vmem [thread:$0]  %s1475_s0, 768, %s20_s10, [#allocation4]  }
  0x12   :  { %s1375_s25 = scalar_lea.hbm %s1476_s1, 12288 }
  0x13   :  { %p1376_p8 = scmp.ne.s32.totalorder %s1476_s1, %s1375_s25  ;;  %p1379_p9 = scmp.lt.u32.totalorder %s1375_s25, %s1476_s1 }
  0x15   :  { %p1381_p10 = pnand %p1379_p9, %p1376_p8 }
  0x17   :  { %1384 = shalt.err (!%p1381_p10)
}
  0x18   :  { %s1385_s30 = scalar_lea.vmem %s1422_s12, 12288  ;;  %p1390_p12 = scmp.lt.s32.totalorder %s1422_s12, %s1422_s12 }
  0x19   :  { %p1386_p11 = scmp.ne.s32.totalorder %s1422_s12, %s1385_s30  ;;  %p1391_p13 = scmp.lt.s32.totalorder %s1385_s30, %s1385_s30 }
  0x1b   :  { %p1392_p0 = por %p1391_p13, %p1390_p12 }
  0x1d   :  { %p1393_p1 = pnand %p1392_p0, %p1386_p11 }
  0x1f   :  { %1396 = shalt.err (!%p1393_p1)
}
  0x20   :  { %s1403_s0 = smov 3072   ;;  %s1404_s3 = smov 192  }
  0x21   :  { %38 = dma.hbm_to_vmem [thread:$0]  %s1476_s1, 12288, %s1422_s12, [#allocation6], %s1403_s0, %s1403_s0, %s1404_s3  }
  0x22   :  { %1397 = dma.done.wait [#allocation4], 768  }
  0x23   :  { %1398 = vsyncadd [#allocation4], 4294966528 }
  0x24   :  { %1399 = dma.done.wait [#allocation6], 12288  }
  0x25   :  { %1400 = vsyncadd [#allocation6], 4294955008  ;;  %v63_v0 = vlaneseq  ;;  %v1405_v1 = vmov 1983009808   ;;  %v295_v5 = vld [vmem:[#allocation5 + $0x8] sm:$0xff]  ;;  %v294_v7 = vld [vmem:[#allocation5] sm:$0xff] }
  0x26   :  { %v145_v2 = vunpack.c.l.s4 %v1405_v1  ;;  %v319_v6 = vld [vmem:[#allocation5 + $0xc8] sm:$0xff]  ;;  %v318_v9 = vld [vmem:[#allocation5 + $0xc0] sm:$0xff]  ;;  %v297_v10 = vld [vmem:[#allocation5 + $0x18] sm:$0xff]  ;;  %vm53_vm1 = vcmask 238592  }
  0x27   :  { %v148_v4 = vshrl.u32 %v63_v0, 7  ;;  %v1245_v8 = vpack.c.bf16 %v319_v6, %v295_v5  ;;  %v321_v11 = vld [vmem:[#allocation5 + $0xd8] sm:$0xff]  ;;  %v1247_v12 = vpack.c.bf16 %v318_v9, %v294_v7  ;;  %v296_v14 = vld [vmem:[#allocation5 + $0x10] sm:$0xff]  ;;  %v343_v16 = vld [vmem:[#allocation5 + $0x188] sm:$0xff] }
  0x28   :  { %v146_v3 = vunpack.c.0.s8 %v145_v2  ;;  %v1253_v13 = vpack.c.bf16 %v321_v11, %v297_v10  ;;  %v320_v15 = vld [vmem:[#allocation5 + $0xd0] sm:$0xff]  ;;  %v367_v19 = vld [vmem:[#allocation5 + $0x248] sm:$0x3f]  ;;  %v342_v21 = vld [vmem:[#allocation5 + $0x180] sm:$0xff] }
  0x29   :  { %1246 = vmatprep.subr.bf16.mxu0 %v1245_v8  ;;  %v1255_v18 = vpack.c.bf16 %v320_v15, %v296_v14  ;;  %v1249_v20 = vpack.c.bf16 %v367_v19, %v343_v16  ;;  %v345_v22 = vld [vmem:[#allocation5 + $0x198] sm:$0xff]  ;;  %v366_v24 = vld [vmem:[#allocation5 + $0x240] sm:$0x3f]  ;;  %v344_v26 = vld [vmem:[#allocation5 + $0x190] sm:$0xff] }
  0x2a   :  { %v1454_v17 = vsub.s32 %v146_v3, %v148_v4  ;;  %1248 = vmatpush1.bf16.xpose.msra.mxu0 %v1247_v12  ;;  %1254 = vmatprep.subr.bf16.mxu1 %v1253_v13  ;;  %v369_v23 = vld [vmem:[#allocation5 + $0x258] sm:$0x3f]  ;;  %v55_v27 = vld [vmem:[#allocation3] sm:$0xff]  ;;  %v299_v31 = vld [vmem:[#allocation5 + $0x28] sm:$0xff]  ;;  %v1251_v35 = vpack.c.bf16 %v366_v24, %v342_v21 }
  0x2b   :  { %1256 = vmatpush1.bf16.xpose.msra.mxu1 %v1255_v18  ;;  %v1257_v25 = vpack.c.bf16 %v369_v23, %v345_v22  ;;  %1250 = vmatprep.subr.bf16.mxu0 %v1249_v20  ;;  %v368_v28 = vld [vmem:[#allocation5 + $0x250] sm:$0x3f]  ;;  %v143_v30 = vcombine.high %v55_v27, %v55_v27  ;;  %v323_v32 = vld [vmem:[#allocation5 + $0xe8] sm:$0xff]  ;;  %v301_v33 = vld [vmem:[#allocation5 + $0x38] sm:$0xff] }
  0x2c   :  { %v150_v29 = vrot.slane %v55_v27, %v1454_v17  ;;  %v325_v34 = vld [vmem:[#allocation5 + $0xf8] sm:$0xff]  ;;  %v1259_v38 = vpack.c.bf16 %v368_v28, %v344_v26  ;;  %v1261_v39 = vpack.c.bf16 %v323_v32, %v299_v31  ;;  %v298_v44 = vld [vmem:[#allocation5 + $0x20] sm:$0xff]  ;;  %v300_v46 = vld [vmem:[#allocation5 + $0x30] sm:$0xff] }
  0x2d   :  { %1258 = vmatprep.subr.bf16.mxu1 %v1257_v25  ;;  %v157_v37 = vrot.slane %v143_v30, %v1454_v17  ;;  %v1269_v41 = vpack.c.bf16 %v325_v34, %v301_v33  ;;  %v56_v42 = vld [vmem:[#allocation3 + $0x8] sm:$0xff]  ;;  %v322_v45 = vld [vmem:[#allocation5 + $0xe0] sm:$0xff]  ;;  %v324_v47 = vld [vmem:[#allocation5 + $0xf0] sm:$0xff] }
  0x2e   :  { %v158_v36 = vcombine.high %v150_v29, %v150_v29  ;;  %v160_v43 = vcombine.high %v56_v42, %v56_v42  ;;  %v347_v48 = vld [vmem:[#allocation5 + $0x1a8] sm:$0xff]  ;;  %v167_v50 = vrot.slane %v56_v42, %v1454_v17  ;;  %v349_v51 = vld [vmem:[#allocation5 + $0x1b8] sm:$0xff]  ;;  %v1263_v54 = vpack.c.bf16 %v322_v45, %v298_v44  ;;  %v346_v60 = vld [vmem:[#allocation5 + $0x1a0] sm:$0xff] }
  0x2f   :  { %v159_v40 = vcombine.high %v157_v37, %v157_v37  ;;  %v371_v49 = vld [vmem:[#allocation5 + $0x268] sm:$0x3f]  ;;  %v373_v52 = vld [vmem:[#allocation5 + $0x278] sm:$0x3f]  ;;  %v1271_v55 = vpack.c.bf16 %v324_v47, %v300_v46  ;;  %v370_v61 = vld [vmem:[#allocation5 + $0x260] sm:$0x3f] }
  0x30   :  { %454 = vmatprep.mubr.f32.mxu0 %v158_v36  ;;  %v174_v53 = vrot.slane %v160_v43, %v1454_v17  ;;  %v1265_v56 = vpack.c.bf16 %v371_v49, %v347_v48  ;;  %v1273_v57 = vpack.c.bf16 %v373_v52, %v349_v51  ;;  %v175_v58 = vcombine.high %v167_v50, %v167_v50  ;;  %v348_v62 = vld [vmem:[#allocation5 + $0x1b0] sm:$0xff]  ;;  %v303_v1 = vld [vmem:[#allocation5 + $0x48] sm:$0xff]  ;;  %v305_v3 = vld [vmem:[#allocation5 + $0x58] sm:$0xff] }
  0x31   :  { %524 = vmatprep.mubr.f32.mxu1 %v159_v40  ;;  %v372_v63 = vld [vmem:[#allocation5 + $0x270] sm:$0x3f]  ;;  %v327_v2 = vld [vmem:[#allocation5 + $0x108] sm:$0xff]  ;;  %v329_v4 = vld [vmem:[#allocation5 + $0x118] sm:$0xff]  ;;  %v1267_v5 = vpack.c.bf16 %v370_v61, %v346_v60 }
  0x32   :  { %1252 = vmatpush1.bf16.xpose.msra.mxu0 %v1251_v35  ;;  %v176_v59 = vcombine.high %v174_v53, %v174_v53  ;;  %v57_v6 = vld [vmem:[#allocation3 + $0x10] sm:$0xff]  ;;  %v1275_v7 = vpack.c.bf16 %v372_v63, %v348_v62  ;;  %v1277_v8 = vpack.c.bf16 %v327_v2, %v303_v1  ;;  %v1285_v9 = vpack.c.bf16 %v329_v4, %v305_v3  ;;  %v304_v13 = vld [vmem:[#allocation5 + $0x50] sm:$0xff]  ;;  %v351_v15 = vld [vmem:[#allocation5 + $0x1c8] sm:$0xff] }
  0x33   :  { %1260 = vmatpush1.bf16.xpose.msra.mxu1 %v1259_v38  ;;  %1262 = vmatprep.subr.bf16.mxu0 %v1261_v39  ;;  %v177_v10 = vcombine.high %v57_v6, %v57_v6  ;;  %v302_v11 = vld [vmem:[#allocation5 + $0x40] sm:$0xff]  ;;  %v328_v14 = vld [vmem:[#allocation5 + $0x110] sm:$0xff]  ;;  %v375_v16 = vld [vmem:[#allocation5 + $0x288] sm:$0x3f]  ;;  %v184_v18 = vrot.slane %v57_v6, %v1454_v17 }
  0x34   :  { %1270 = vmatprep.subr.bf16.mxu1 %v1269_v41  ;;  %v326_v12 = vld [vmem:[#allocation5 + $0x100] sm:$0xff]  ;;  %v353_v19 = vld [vmem:[#allocation5 + $0x1d8] sm:$0xff]  ;;  %v1287_v23 = vpack.c.bf16 %v328_v14, %v304_v13  ;;  %v1281_v24 = vpack.c.bf16 %v375_v16, %v351_v15  ;;  %v352_v30 = vld [vmem:[#allocation5 + $0x1d0] sm:$0xff] }
  0x35   :  { %v377_v20 = vld [vmem:[#allocation5 + $0x298] sm:$0x3f]  ;;  %v191_v21 = vrot.slane %v177_v10, %v1454_v17  ;;  %v1279_v22 = vpack.c.bf16 %v326_v12, %v302_v11  ;;  %v192_v26 = vcombine.high %v184_v18, %v184_v18  ;;  %v350_v28 = vld [vmem:[#allocation5 + $0x1c0] sm:$0xff]  ;;  %v376_v31 = vld [vmem:[#allocation5 + $0x290] sm:$0x3f] }
  0x36   :  { %v1289_v25 = vpack.c.bf16 %v377_v20, %v353_v19  ;;  %v307_v32 = vld [vmem:[#allocation5 + $0x68] sm:$0xff]  ;;  %v309_v34 = vld [vmem:[#allocation5 + $0x78] sm:$0xff]  ;;  %v1291_v38 = vpack.c.bf16 %v376_v31, %v352_v30  ;;  %v306_v42 = vld [vmem:[#allocation5 + $0x60] sm:$0xff] }
  0x37   :  { %v193_v27 = vcombine.high %v191_v21, %v191_v21  ;;  %v331_v33 = vld [vmem:[#allocation5 + $0x128] sm:$0xff]  ;;  %v333_v35 = vld [vmem:[#allocation5 + $0x138] sm:$0xff]  ;;  %v330_v43 = vld [vmem:[#allocation5 + $0x120] sm:$0xff] }
  0x38   :  { %v1293_v39 = vpack.c.bf16 %v331_v33, %v307_v32  ;;  %v1301_v40 = vpack.c.bf16 %v333_v35, %v309_v34  ;;  %v308_v44 = vld [vmem:[#allocation5 + $0x70] sm:$0xff]  ;;  %v355_v46 = vld [vmem:[#allocation5 + $0x1e8] sm:$0xff]  ;;  %v357_v49 = vld [vmem:[#allocation5 + $0x1f8] sm:$0xff]  ;;  %v1295_v52 = vpack.c.bf16 %v330_v43, %v306_v42 }
  0x39   :  { %455 = vmatmul.mubr.f32.vlgmr.msra.gmra.mrb[0].mxu0 %v150_v29  ;;  %v374_v29 = vld [vmem:[#allocation5 + $0x280] sm:$0x3f]  ;;  %v332_v45 = vld [vmem:[#allocation5 + $0x130] sm:$0xff]  ;;  %v379_v47 = vld [vmem:[#allocation5 + $0x2a8] sm:$0x3f] }
  0x3a   :  { %525 = vmatmul.mubr.f32.vlgmr.msra.gmra.mrb[0].mxu1 %v157_v37  ;;  %1264 = vmatpush1.bf16.xpose.msra.mxu0 %v1263_v54  ;;  %v1283_v36 = vpack.c.bf16 %v374_v29, %v350_v28  ;;  %v58_v37 = vld [vmem:[#allocation3 + $0x18] sm:$0xff]  ;;  %v1297_v54 = vpack.c.bf16 %v379_v47, %v355_v46  ;;  %v356_v60 = vld [vmem:[#allocation5 + $0x1f0] sm:$0xff]  ;;  %v313_v1 = vld [vmem:[#allocation5 + $0x98] sm:$0xff] }
  0x3b   :  { %1272 = vmatpush1.bf16.xpose.msra.mxu1 %v1271_v55  ;;  %1266 = vmatprep.subr.bf16.mxu0 %v1265_v56  ;;  %v194_v41 = vcombine.high %v58_v37, %v58_v37  ;;  %v201_v48 = vrot.slane %v58_v37, %v1454_v17  ;;  %v380_v61 = vld [vmem:[#allocation5 + $0x2b0] sm:$0x3f]  ;;  %v311_v62 = vld [vmem:[#allocation5 + $0x88] sm:$0xff]  ;;  %v337_v2 = vld [vmem:[#allocation5 + $0x158] sm:$0xff] }
  0x3c   :  { %1274 = vmatprep.subr.bf16.mxu1 %v1273_v57  ;;  %594 = vmatprep.mubr.f32.mxu0 %v175_v58  ;;  %v354_v58 = vld [vmem:[#allocation5 + $0x1e0] sm:$0xff]  ;;  %v335_v63 = vld [vmem:[#allocation5 + $0x148] sm:$0xff]  ;;  %v59_v4 = vld [vmem:[#allocation3 + $0x20] sm:$0xff] }
  0x3d   :  { %664 = vmatprep.mubr.f32.mxu1 %v176_v59  ;;  %v208_v51 = vrot.slane %v194_v41, %v1454_v17  ;;  %v209_v56 = vcombine.high %v201_v48, %v201_v48  ;;  %v378_v59 = vld [vmem:[#allocation5 + $0x2a0] sm:$0x3f]  ;;  %v1309_v6 = vpack.c.bf16 %v335_v63, %v311_v62  ;;  %v312_v11 = vld [vmem:[#allocation5 + $0x90] sm:$0xff]  ;;  %v359_v13 = vld [vmem:[#allocation5 + $0x208] sm:$0xff]  ;;  %v218_v15 = vrot.slane %v59_v4, %v1454_v17 }
  0x3e   :  { %v1299_v3 = vpack.c.bf16 %v378_v59, %v354_v58  ;;  %v334_v10 = vld [vmem:[#allocation5 + $0x140] sm:$0xff]  ;;  %v336_v12 = vld [vmem:[#allocation5 + $0x150] sm:$0xff]  ;;  %v383_v14 = vld [vmem:[#allocation5 + $0x2c8] sm:$0x3f]  ;;  %v1406_v62 = vmov 0.0  }
  0x3f   :  { %v210_v57 = vcombine.high %v208_v51, %v208_v51  ;;  %v361_v16 = vld [vmem:[#allocation5 + $0x218] sm:$0xff]  ;;  %v360_v28 = vld [vmem:[#allocation5 + $0x210] sm:$0xff]  ;;  %v315_v30 = vld [vmem:[#allocation5 + $0xa8] sm:$0xff]  ;;  %54 = vst.msk [vmem:[#allocation2] sm:$0x3] %vm53_vm1, %v1406_v62 }
  0x40   :  { %v384_v29 = vld [vmem:[#allocation5 + $0x2d0] sm:$0x3f]  ;;  %v339_v31 = vld [vmem:[#allocation5 + $0x168] sm:$0xff]  ;;  %v317_v32 = vld [vmem:[#allocation5 + $0xb8] sm:$0xff] }
  0x41   :  { %v341_v33 = vld [vmem:[#allocation5 + $0x178] sm:$0xff]  ;;  %v1325_v37 = vpack.c.bf16 %v339_v31, %v315_v30  ;;  %v314_v41 = vld [vmem:[#allocation5 + $0xa0] sm:$0xff]  ;;  %v316_v43 = vld [vmem:[#allocation5 + $0xb0] sm:$0xff] }
  0x42   :  { %1268 = vmatpush1.bf16.xpose.msra.mxu0 %v1267_v5  ;;  %v1307_v5 = vpack.c.bf16 %v380_v61, %v356_v60  ;;  %v60_v35 = vld [vmem:[#allocation3 + $0x28] sm:$0xff]  ;;  %v338_v42 = vld [vmem:[#allocation5 + $0x160] sm:$0xff]  ;;  %v387_v46 = vld [vmem:[#allocation5 + $0x2e8] sm:$0x3f] }
  0x43   :  { %1276 = vmatpush1.bf16.xpose.msra.mxu1 %v1275_v7  ;;  %1278 = vmatprep.subr.bf16.mxu0 %v1277_v8  ;;  %v1317_v7 = vpack.c.bf16 %v337_v2, %v313_v1  ;;  %v211_v8 = vcombine.high %v59_v4, %v59_v4  ;;  %v235_v47 = vrot.slane %v60_v35, %v1454_v17  ;;  %v386_v58 = vld [vmem:[#allocation5 + $0x2e0] sm:$0x3f]  ;;  %v364_v59 = vld [vmem:[#allocation5 + $0x230] sm:$0xff] }
  0x44   :  { %1286 = vmatprep.subr.bf16.mxu1 %v1285_v9  ;;  %v310_v9 = vld [vmem:[#allocation5 + $0x80] sm:$0xff]  ;;  %v388_v60 = vld [vmem:[#allocation5 + $0x2f0] sm:$0x3f] }
  0x45   :  { %v225_v19 = vrot.slane %v211_v8, %v1454_v17  ;;  %v1311_v20 = vpack.c.bf16 %v334_v10, %v310_v9  ;;  %v1339_v61 = vpack.c.bf16 %v388_v60, %v364_v59 }
  0x49   :  { %595 = vmatmul.mubr.f32.vlgmr.msra.gmra.mrb[2].mxu0 %v167_v50  ;;  %v381_v50 = vld [vmem:[#allocation5 + $0x2b8] sm:$0x3f] }
  0x4a   :  { %1280 = vmatpush1.bf16.xpose.msra.mxu0 %v1279_v22  ;;  %665 = vmatmul.mubr.f32.vlgmr.msra.gmra.mrb[2].mxu1 %v174_v53  ;;  %v1303_v53 = vpack.c.bf16 %v332_v45, %v308_v44  ;;  %v1305_v55 = vpack.c.bf16 %v381_v50, %v357_v49  ;;  %v1313_v22 = vpack.c.bf16 %v383_v14, %v359_v13  ;;  %v340_v44 = vld [vmem:[#allocation5 + $0x170] sm:$0xff]  ;;  %v363_v45 = vld [vmem:[#allocation5 + $0x228] sm:$0xff]  ;;  %v389_v49 = vld [vmem:[#allocation5 + $0x2f8] sm:$0x3f] }
  0x4b   :  { %1288 = vmatpush1.bf16.xpose.msra.mxu1 %v1287_v23  ;;  %1282 = vmatprep.subr.bf16.mxu0 %v1281_v24  ;;  %v226_v24 = vcombine.high %v218_v15, %v218_v15 }
  0x4c   :  { %1290 = vmatprep.subr.bf16.mxu1 %v1289_v25  ;;  %734 = vmatprep.mubr.f32.mxu0 %v192_v26  ;;  %v227_v25 = vcombine.high %v225_v19, %v225_v19  ;;  %v358_v26 = vld [vmem:[#allocation5 + $0x200] sm:$0xff] }
  0x4d   :  { %804 = vmatprep.mubr.f32.mxu1 %v193_v27  ;;  %v382_v27 = vld [vmem:[#allocation5 + $0x2c0] sm:$0x3f] }
  0x4e   :  { %v1315_v34 = vpack.c.bf16 %v382_v27, %v358_v26 }
  0x52   :  { %1284 = vmatpush1.bf16.xpose.msra.mxu0 %v1283_v36  ;;  %v1323_v36 = vpack.c.bf16 %v384_v29, %v360_v28 }
  0x53   :  { %1292 = vmatpush1.bf16.xpose.msra.mxu1 %v1291_v38  ;;  %1294 = vmatprep.subr.bf16.mxu0 %v1293_v39  ;;  %v1333_v38 = vpack.c.bf16 %v341_v33, %v317_v32  ;;  %v228_v39 = vcombine.high %v60_v35, %v60_v35 }
  0x54   :  { %1302 = vmatprep.subr.bf16.mxu1 %v1301_v40  ;;  %v64_v40 = vand.u32 127, %v63_v0 }
  0x55   :  { %v242_v50 = vrot.slane %v228_v39, %v1454_v17 }
  0x59   :  { %735 = vmatmul.mubr.f32.vlgmr.msra.gmra.mrb[4].mxu0 %v184_v18  ;;  %v385_v18 = vld [vmem:[#allocation5 + $0x2d8] sm:$0x3f] }
  0x5a   :  { %1296 = vmatpush1.bf16.xpose.msra.mxu0 %v1295_v52  ;;  %805 = vmatmul.mubr.f32.vlgmr.msra.gmra.mrb[4].mxu1 %v191_v21  ;;  %v1319_v21 = vpack.c.bf16 %v336_v12, %v312_v11  ;;  %v1321_v23 = vpack.c.bf16 %v385_v18, %v361_v16  ;;  %v87_v52 = vadd.s32 2944, %v64_v40 }
  0x5b   :  { %1304 = vmatpush1.bf16.xpose.msra.mxu1 %v1303_v53  ;;  %1298 = vmatprep.subr.bf16.mxu0 %v1297_v54  ;;  %v1335_v53 = vpack.c.bf16 %v340_v44, %v316_v43  ;;  %v1329_v54 = vpack.c.bf16 %v387_v46, %v363_v45 }
  0x5c   :  { %1306 = vmatprep.subr.bf16.mxu1 %v1305_v55  ;;  %874 = vmatprep.mubr.f32.mxu0 %v209_v56  ;;  %v243_v55 = vcombine.high %v235_v47, %v235_v47  ;;  %v244_v56 = vcombine.high %v242_v50, %v242_v50  ;;  %vm136_vm0 = vcmp.lt.s32.totalorder %v87_v52, 3000 }
  0x5d   :  { %944 = vmatprep.mubr.f32.mxu1 %v210_v57  ;;  %v362_v57 = vld [vmem:[#allocation5 + $0x220] sm:$0xff] }
  0x5e   :  { %v1331_v17 = vpack.c.bf16 %v386_v58, %v362_v57 }
  0x62   :  { %1300 = vmatpush1.bf16.xpose.msra.mxu0 %v1299_v3 }
  0x63   :  { %1308 = vmatpush1.bf16.xpose.msra.mxu1 %v1307_v5  ;;  %1310 = vmatprep.subr.bf16.mxu0 %v1309_v6 }
  0x64   :  { %1318 = vmatprep.subr.bf16.mxu1 %v1317_v7 }
  0x69   :  { %875 = vmatmul.mubr.f32.vlgmr.msra.gmra.mrb[6].mxu0 %v201_v48  ;;  %v365_v48 = vld [vmem:[#allocation5 + $0x238] sm:$0xff] }
  0x6a   :  { %1312 = vmatpush1.bf16.xpose.msra.mxu0 %v1311_v20  ;;  %945 = vmatmul.mubr.f32.vlgmr.msra.gmra.mrb[6].mxu1 %v208_v51  ;;  %v1327_v51 = vpack.c.bf16 %v338_v42, %v314_v41  ;;  %v1337_v0 = vpack.c.bf16 %v389_v49, %v365_v48 }
  0x6b   :  { %1320 = vmatpush1.bf16.xpose.msra.mxu1 %v1319_v21  ;;  %1314 = vmatprep.subr.bf16.mxu0 %v1313_v22 }
  0x6c   :  { %1322 = vmatprep.subr.bf16.mxu1 %v1321_v23  ;;  %1014 = vmatprep.mubr.f32.mxu0 %v226_v24 }
  0x6d   :  { %1084 = vmatprep.mubr.f32.mxu1 %v227_v25 }
  0x72   :  { %1316 = vmatpush1.bf16.xpose.msra.mxu0 %v1315_v34  ;;  %v293_v34 = vld [vmem:[#allocation2] sm:$0x3] }
  0x73   :  { %1324 = vmatpush1.bf16.xpose.msra.mxu1 %v1323_v36  ;;  %1326 = vmatprep.subr.bf16.mxu0 %v1325_v37 }
  0x74   :  { %1334 = vmatprep.subr.bf16.mxu1 %v1333_v38 }
  0x79   :  { %1015 = vmatmul.mubr.f32.vlgmr.msra.gmra.mrb[8].mxu0 %v218_v15 }
  0x7a   :  { %1328 = vmatpush1.bf16.xpose.msra.mxu0 %v1327_v51  ;;  %1085 = vmatmul.mubr.f32.vlgmr.msra.gmra.mrb[8].mxu1 %v225_v19 }
  0x7b   :  { %1336 = vmatpush1.bf16.xpose.msra.mxu1 %v1335_v53  ;;  %1330 = vmatprep.subr.bf16.mxu0 %v1329_v54 }
  0x7c   :  { %1338 = vmatprep.subr.bf16.mxu1 %v1337_v0  ;;  %1154 = vmatprep.mubr.f32.mxu0 %v243_v55 }
  0x7d   :  { %1244 = vmatprep.mubr.msk.f32.mxu1 %vm136_vm0, %v244_v56 }
  0x82   :  { %1332 = vmatpush1.bf16.xpose.msra.mxu0 %v1331_v17 }
  0x83   :  { %1340 = vmatpush1.bf16.xpose.msra.mxu1 %v1339_v61 }
  0x89   :  { %1155 = vmatmul.mubr.f32.vlgmr.msra.gmra.mrb[10].mxu0 %v235_v47 }
  0x8a   :  { %1225 = vmatmul.mubr.f32.vlgmr.msra.gmra.mrb[10].mxu1 %v242_v50 }
 0x10c   :  { %v456_v63 = vpop.f32.mrb[0].mxu0 }
 0x10d   :  { %v458_v1 = vpop.f32.mrb[1].mxu0  ;;  %v526_v2 = vpop.f32.mrb[0].mxu1 }
 0x10e   :  { %v527_v3 = vadd.f32 %v526_v2, %v456_v63  ;;  %v528_v4 = vpop.f32.mrb[1].mxu1 }
 0x11c   :  { %v596_v5 = vpop.f32.mrb[2].mxu0 }
 0x11d   :  { %v597_v6 = vadd.f32 %v596_v5, %v527_v3  ;;  %v598_v7 = vpop.f32.mrb[3].mxu0  ;;  %v666_v8 = vpop.f32.mrb[2].mxu1 }
 0x11e   :  { %v668_v9 = vpop.f32.mrb[3].mxu1 }
 0x11f   :  { %v667_v10 = vadd.f32 %v666_v8, %v597_v6 }
 0x12c   :  { %v736_v11 = vpop.f32.mrb[4].mxu0 }
 0x12d   :  { %v737_v12 = vadd.f32 %v736_v11, %v667_v10  ;;  %v738_v13 = vpop.f32.mrb[5].mxu0  ;;  %v806_v14 = vpop.f32.mrb[4].mxu1 }
 0x12e   :  { %v808_v15 = vpop.f32.mrb[5].mxu1 }
 0x12f   :  { %v807_v16 = vadd.f32 %v806_v14, %v737_v12 }
 0x13c   :  { %v876_v18 = vpop.f32.mrb[6].mxu0 }
 0x13d   :  { %v877_v19 = vadd.f32 %v876_v18, %v807_v16  ;;  %v878_v20 = vpop.f32.mrb[7].mxu0  ;;  %v946_v21 = vpop.f32.mrb[6].mxu1 }
 0x13e   :  { %v948_v22 = vpop.f32.mrb[7].mxu1 }
 0x13f   :  { %v947_v23 = vadd.f32 %v946_v21, %v877_v19 }
 0x14c   :  { %v1016_v24 = vpop.f32.mrb[8].mxu0 }
 0x14d   :  { %v1017_v25 = vadd.f32 %v1016_v24, %v947_v23  ;;  %v1018_v26 = vpop.f32.mrb[9].mxu0  ;;  %v1086_v27 = vpop.f32.mrb[8].mxu1 }
 0x14e   :  { %v1088_v28 = vpop.f32.mrb[9].mxu1 }
 0x14f   :  { %v1087_v29 = vadd.f32 %v1086_v27, %v1017_v25 }
 0x15c   :  { %v1156_v30 = vpop.f32.mrb[10].mxu0 }
 0x15d   :  { %v1157_v31 = vadd.f32 %v1156_v30, %v1087_v29  ;;  %v1158_v32 = vpop.f32.mrb[11].mxu0  ;;  %v1226_v33 = vpop.f32.mrb[10].mxu1 }
 0x15e   :  { %v1228_v35 = vpop.f32.mrb[11].mxu1 }
 0x15f   :  { %v1227_v36 = vadd.f32 %v1226_v33, %v1157_v31 }
 0x161   :  { %v1230_v37 = vadd.f32 %v1227_v36, %v293_v34 }
 0x163   :  { %1232 = vst.msk [vmem:[#allocation2] sm:$0x3] %vm53_vm1, %v1230_v37 }
 0x16a   :  { %v1236_v38 = vld [vmem:[#allocation2] sm:$0x3] }
 0x16b   :  { %1237 = vst.msk [vmem:[%s1477_s2] sm:$0x3] %vm53_vm1, %v1236_v38 }
 0x16c   :  { %1242 = vsyncpa [#allocation4], 1 }
 0x16d   :  { %1243 = vsyncpa [#allocation6], 1 }

</bundles_post_ra>
